<compile_context>
chip_gen: v7x
topology: tpu7x:2x2x1
jax: 0.10.0
libtpu: 0.0.40
codegen_flags: <defaults>
</compile_context>

<pallas_src>
import functools

import jax
import jax.numpy as jnp
from jax.experimental import pallas as pl
from jax.experimental.pallas import tpu as pltpu

COUT = 256          # conv1 out_channels
UPSCALE = 2         # pixel_shuffle factor
KSIZE = 3           # conv kernel size


def _conv_shuffle_prelu_kernel(p_ref, w_ref, alpha_ref, o_ref, *, TH, W):
    """One (batch, row-strip) tile per grid step.

    p_ref:     (1, TH*W, 9*Cin)   im2col patches for this strip         (VMEM)
    w_ref:     (9*Cin, 256)       weights, out-chans ordered (i, j, c)  (VMEM, resident)
    alpha_ref: (1,)               PReLU slope                           (SMEM)
    o_ref:     (1, 2*TH, W, 128)  pixel-shuffled NHWC output strip      (VMEM)
    """
    # Single MXU matmul (K = 9*Cin), f32 accumulation.
    acc = jnp.dot(p_ref[0], w_ref[...],
                  preferred_element_type=jnp.float32)        # (TH*W, 256)

    # PReLU with a single shared slope.
    alpha = alpha_ref[0]
    acc = jnp.where(acc >= 0.0, acc, alpha * acc)

    # Fused pixel shuffle: channels are ordered i*128 + j*64 + c, so the two
    # lane-aligned 128-wide halves are exactly the even (i=0) / odd (i=1)
    # output rows; interleave them along the row dimension.
    even = acc[:, :128].reshape(TH, 1, W, 128)
    odd = acc[:, 128:].reshape(TH, 1, W, 128)
    out = jnp.concatenate([even, odd], axis=1).reshape(2 * TH, W, 128)
    o_ref[0] = out.astype(o_ref.dtype)


def _choose_tile_h(H, W):
    """Largest TH dividing H such that the f32 output strip (2*TH, W, 128) stays
    <= ~1 MiB and (when possible) there are >= 2 strips for pipelining.  Also keep
    TH*W a multiple of 8 so the patch block's second-to-last dim is legal."""
    limit = max(1, (1 << 20) // (2 * W * 128 * 4))
    if H > 1:
        limit = min(limit, H // 2)
    best = H  # fallback: full-height strip (always legal: block == full dims)
    for th in range(1, H + 1):
        if H % th == 0 and th <= limit and (th * W) % 8 == 0:
            best = th
    return best


def pixel_shuffle_block(x_nchw, weight, alpha, *, compute_dtype=jnp.float32):
    """Forward pass of PixelShuffleBlock.

    x_nchw: (N, Cin, H, W) float32
    weight: (COUT, Cin, 3, 3) float32   (torch Conv2d layout, bias=False)
    alpha:  (1,) float32                (PReLU slope)
    returns (N, COUT // 4, 2H, 2W) float32  (NCHW, matching torch)
    """
    N, Cin, H, W = x_nchw.shape
    K = KSIZE * KSIZE * Cin
    r = UPSCALE
    c_out = COUT // (r * r)     # 64

    # ---- wrapper glue: im2col (tap-major, cin-minor).  The input side is the
    # small tensor (9*Cin channels vs 256 output channels), so this adds little
    # HBM traffic while turning the conv into one clean MXU contraction. ----
    x_nhwc = jnp.transpose(x_nchw, (0, 2, 3, 1))                    # (N,H,W,Cin)
    x_pad = jnp.pad(x_nhwc, ((0, 0), (1, 1), (1, 1), (0, 0)))       # (N,H+2,W+2,Cin)
    taps = [x_pad[:, kh:kh + H, kw:kw + W, :]
            for kh in range(KSIZE) for kw in range(KSIZE)]
    patches = jnp.concatenate(taps, axis=-1).reshape(N, H * W, K)   # (N, H*W, 9*Cin)

    # Weights: (COUT, Cin, 3, 3) -> rows ordered (kh, kw, cin) to match the patch
    # K ordering, cols reordered so chan' = i*128 + j*64 + c for torch output
    # channel c*4 + 2*i + j.  This permutation is what makes the pixel shuffle a
    # pure in-kernel row interleave of lane-aligned halves.
    w = weight.reshape(c_out, r, r, Cin, KSIZE, KSIZE)      # [c, i, j, cin, kh, kw]
    w = jnp.transpose(w, (4, 5, 3, 1, 2, 0))                # [kh, kw, cin, i, j, c]
    w_mat = w.reshape(K, COUT)

    patches = patches.astype(compute_dtype)   # bf16 on v6e/v7x if desired
    w_mat = w_mat.astype(compute_dtype)
    alpha = jnp.asarray(alpha, jnp.float32).reshape(1)

    TH = _choose_tile_h(H, W)
    grid = (N, H // TH)
    kernel = functools.partial(_conv_shuffle_prelu_kernel, TH=TH, W=W)

    shuffled = pl.pallas_call(
        kernel,
        out_shape=jax.ShapeDtypeStruct((N, r * H, W, r * c_out), jnp.float32),
        grid_spec=pltpu.PrefetchScalarGridSpec(
            num_scalar_prefetch=0,
            grid=grid,
            in_specs=[
                pl.BlockSpec((1, TH * W, K), lambda n, s: (n, s, 0)),
                pl.BlockSpec((K, COUT), lambda n, s: (0, 0)),
                pl.BlockSpec(memory_space=pltpu.SMEM),
            ],
            out_specs=pl.BlockSpec((1, r * TH, W, r * c_out),
                                   lambda n, s: (n, s, 0, 0)),
        ),
        compiler_params=pltpu.CompilerParams(
            dimension_semantics=("parallel", "parallel")),
    )(patches, w_mat, alpha)

    # Free contiguous reshape: (N, 2H, W, 128) -> (N, 2H, 2W, 64), then the
    # unavoidable NHWC -> NCHW boundary transpose to match torch output layout.
    y = shuffled.reshape(N, r * H, r * W, c_out)
    return jnp.transpose(y, (0, 3, 1, 2))


def _reference(x_nchw, weight, alpha):
    """Pure-JAX reference (lax conv + pixel shuffle + PReLU) for sanity."""
    conv = jax.lax.conv_general_dilated(
        x_nchw, weight, window_strides=(1, 1), padding=((1, 1), (1, 1)),
        dimension_numbers=("NCHW", "OIHW", "NCHW"))
    N, C, H, W = conv.shape
    r = UPSCALE
    c_out = C // (r * r)
    y = conv.reshape(N, c_out, r, r, H, W)
    y = jnp.transpose(y, (0, 1, 4, 2, 5, 3)).reshape(N, c_out, H * r, W * r)
    a = jnp.asarray(alpha, jnp.float32).reshape(())
    return jnp.where(y >= 0, y, a * y)


if __name__ == "__main__":
    key = jax.random.PRNGKey(0)
    k_x, k_w = jax.random.split(key)

    N, Cin, H, W = 2, 4, 16, 16
    x = jax.random.normal(k_x, (N, Cin, H, W), dtype=jnp.float32)
    # Deterministic conv weight (torch layout: out_ch, in_ch, kh, kw), no bias.
    weight = 0.1 * jax.random.normal(k_w, (COUT, Cin, KSIZE, KSIZE), dtype=jnp.float32)
    # PReLU default init.
    alpha = jnp.array([0.25], dtype=jnp.float32)

    out = pixel_shuffle_block(x, weight, alpha)
    out = jax.block_until_ready(out)

    ref = _reference(x, weight, alpha)
    assert out.shape == (N, COUT // 4, UPSCALE * H, UPSCALE * W), out.shape
    assert jnp.allclose(out, ref, atol=1e-4, rtol=1e-4), "mismatch vs reference"

    print("KERNEL_OK")
</pallas_src>

<mosaic_0001>
module attributes {stable_mosaic.version = 11 : i64} {
  func.func @_conv_shuffle_prelu_kernel(%arg0: i32, %arg1: i32, %arg2: memref<1x128x36xf32, #tpu.memory_space<vmem>>, %arg3: memref<36x256xf32, #tpu.memory_space<vmem>>, %arg4: memref<1xf32, #tpu.memory_space<smem>>, %arg5: memref<1x16x16x128xf32, #tpu.memory_space<vmem>>) attributes {dimension_semantics = [#tpu.dimension_semantics<parallel>, #tpu.dimension_semantics<parallel>], iteration_bounds = array<i64: 2, 2>, scalar_prefetch = 0 : i64, scratch_operands = 0 : i64, tpu.core_type = #tpu.core_type<tc>, window_params = [{transform_indices = @transform_0, window_bounds = array<i64: 1, 128, 36>}, {pipeline_mode = #tpu.pipeline_mode<synchronous>, transform_indices = @transform_1, window_bounds = array<i64: 36, 256>}, {transform_indices = @transform_2, window_bounds = array<i64: 1>}, {transform_indices = @transform_3, window_bounds = array<i64: 1, 16, 16, 128>}]} {
    %c0 = arith.constant 0 : index
    %c0_0 = arith.constant 0 : index
    %c0_1 = arith.constant 0 : index
    %0 = vector.load %arg2[%c0, %c0_0, %c0_1] : memref<1x128x36xf32, #tpu.memory_space<vmem>>, vector<1x128x36xf32>
    %1 = vector.shape_cast %0 : vector<1x128x36xf32> to vector<128x36xf32>
    %c0_2 = arith.constant 0 : index
    %c0_3 = arith.constant 0 : index
    %2 = vector.load %arg3[%c0_2, %c0_3] : memref<36x256xf32, #tpu.memory_space<vmem>>, vector<36x256xf32>
    %cst = arith.constant dense<0.000000e+00> : vector<128x256xf32>
    %3 = tpu.matmul %1, %2, %cst {dimension_numbers = #tpu.dot_dimension_numbers<[1], [0], [0], [1], [0, 0, 1, 1], [], []>} : vector<128x36xf32>, vector<36x256xf32>, vector<128x256xf32> -> vector<128x256xf32>
    %c0_4 = arith.constant 0 : index
    %4 = memref.load %arg4[%c0_4] : memref<1xf32, #tpu.memory_space<smem>>
    %cst_5 = arith.constant 0.000000e+00 : f32
    %5 = vector.broadcast %cst_5 : f32 to vector<128x256xf32>
    %6 = arith.cmpf oge, %3, %5 : vector<128x256xf32>
    %7 = vector.broadcast %4 : f32 to vector<128x256xf32>
    %8 = arith.mulf %7, %3 : vector<128x256xf32>
    %9 = arith.select %6, %3, %8 : vector<128x256xi1>, vector<128x256xf32>
    %10 = vector.extract_strided_slice %9 {offsets = [0, 0], sizes = [128, 128], strides = [1, 1]} : vector<128x256xf32> to vector<128x128xf32>
    %11 = vector.shape_cast %10 : vector<128x128xf32> to vector<8x1x16x128xf32>
    %12 = vector.extract_strided_slice %9 {offsets = [0, 128], sizes = [128, 128], strides = [1, 1]} : vector<128x256xf32> to vector<128x128xf32>
    %13 = vector.shape_cast %12 : vector<128x128xf32> to vector<8x1x16x128xf32>
    %14 = tpu.concatenate %11, %13 in 1 : vector<8x1x16x128xf32>, vector<8x1x16x128xf32> -> vector<8x2x16x128xf32>
    %15 = vector.shape_cast %14 : vector<8x2x16x128xf32> to vector<16x16x128xf32>
    %c0_6 = arith.constant 0 : index
    %c0_7 = arith.constant 0 : index
    %c0_8 = arith.constant 0 : index
    %c0_9 = arith.constant 0 : index
    %16 = vector.load %arg5[%c0_6, %c0_7, %c0_8, %c0_9] : memref<1x16x16x128xf32, #tpu.memory_space<vmem>>, vector<1x16x16x128xf32>
    %17 = vector.shape_cast %16 : vector<1x16x16x128xf32> to vector<16x16x128xf32>
    %18 = vector.shape_cast %15 : vector<16x16x128xf32> to vector<1x16x16x128xf32>
    tpu.vector_store %arg5[%c0_6, %c0_7, %c0_8, %c0_9], %18 {strides = array<i32>} : memref<1x16x16x128xf32, #tpu.memory_space<vmem>>, vector<1x16x16x128xf32>,
    return
  }
  func.func @transform_0(%arg0: i32, %arg1: i32) -> (i32, i32, i32) {
    %c0_i32 = arith.constant 0 : i32
    %c0_i32_0 = arith.constant 0 : i32
    return %arg0, %arg1, %c0_i32 : i32, i32, i32
  }
  func.func @transform_1(%arg0: i32, %arg1: i32) -> (i32, i32) {
    %c0_i32 = arith.constant 0 : i32
    %c0_i32_0 = arith.constant 0 : i32
    %c0_i32_1 = arith.constant 0 : i32
    return %c0_i32, %c0_i32_0 : i32, i32
  }
  func.func @transform_2(%arg0: i32, %arg1: i32) -> i32 {
    %c0_i32 = arith.constant 0 : i32
    %c0_i32_0 = arith.constant 0 : i32
    return %c0_i32 : i32
  }
  func.func @transform_3(%arg0: i32, %arg1: i32) -> (i32, i32, i32, i32) {
    %c0_i32 = arith.constant 0 : i32
    %c0_i32_0 = arith.constant 0 : i32
    %c0_i32_1 = arith.constant 0 : i32
    return %arg0, %arg1, %c0_i32, %c0_i32_0 : i32, i32, i32, i32
  }
}

</mosaic_0001>

<bundles_post_ra>
// kernel: tpu_custom_call.1
= control target key start
LH: loop header
LB: loop body
LE: loop exit
PB: predicated region body
PF: predicated region fallthrough
CT: control target
= control target key end

     0   :  { %s1214_s0 = inlined_call_operand.vmem [shape: f32[2,256,36], index: 0, kind: input, shape index: {}]   ;;  %s1215_s1 = inlined_call_operand.vmem [shape: f32[36,256], index: 1, kind: input, shape index: {}]   ;;  %s1216_s2 = inlined_call_operand.<no memory space> [shape: f32[1], index: 2, kind: input, shape index: {}]   ;;  %s1217_s3 = inlined_call_operand.hbm [shape: f32[2,32,16,128], index: 3, kind: output, shape index: {}]  }
   0x1   :  { %8 = sst [smem:[#allocation2]] %s1216_s2 }
   0x2   :  { %9 = vsyncpa [#allocation4], 0 }
   0x3   :  { %11 = vsyncpa [#allocation4 + $0x1], 0  ;;  %s919_s14 = smov 0   ;;  %s921_s15 = smov 0  }
   0x4   :  { %s923_s16 = smov 0   ;;  %s925_s17 = smov 0  }
   0x5   :  { %s927_s18 = smov 0   ;;  %s929_s19 = smov 0  }
   0x6   :  { %s931_s20 = smov 0   ;;  %s933_s21 = smov 0  }
   0x7 LB: > { %s673_s2 = sadd.s32 4294967295, %s890_s21   ;;  %s674_s22 = sadd.s32 4294967294, %s890_s21   ;;  %s890_s21 = sphi %s933_s21, %s17_s21   ;;  %s886_s20 = sphi %s931_s20, %s1226_s20   ;;  %s882_s19 = sphi %s929_s19, %s1225_s19   ;;  %s878_s18 = sphi %s927_s18, %s1224_s18   ;;  %s874_s17 = sphi %s925_s17, %s1223_s17   ;;  %s870_s16 = sphi %s923_s16, %s1222_s16   ;;  %s866_s15 = sphi %s921_s15, %s1221_s15   ;;  %s862_s14 = sphi %s919_s14, %s1220_s14  }
   0x8   : > { %s26_s23 = sadd.s32 1, %s882_s19  ;;  %s29_s24 = sadd.s32 1, %s886_s20 }
   0x9   : > { %p27_p0 = scmp.ge.s32.totalorder %s26_s23, 2  ;;  %p118_p1 = scmp.ne.s32.totalorder %s870_s16, %s866_s15 }
   0xa   : > { %p119_p2 = scmp.eq.s32.totalorder %s673_s2, 3  ;;  %p124_p5 = scmp.ne.s32.totalorder %s866_s15, %s862_s14 }
   0xb   : > { %s1228_s23 = smov (%p27_p0, %s26_s23), 0  ;;  %s1230_s24 = smov (!%p27_p0, %s29_s24), %s886_s20 }
   0xc   : > { %s104_s25 = ssub.s32 %s882_s19, %s1228_s23  ;;  %p970_p3 = por %p119_p2, %p118_p1 }
   0xd   : > { %p31_p4 = scmp.ge.s32.totalorder %s1230_s24, 2  ;;  %p125_p6 = scmp.eq.s32.totalorder %s674_s22, 3 }
   0xe   : > { %p677_p7 = scmp.ge.s32.totalorder %s890_s21, 1  ;;  %p162_p9 = scmp.lt.s32.totalorder %s890_s21, 5 }
   0xf   : > { %s1232_s24 = smov (%p31_p4, %s1230_s24), 0  ;;  %p979_p8 = por %p125_p6, %p124_p5 }
  0x10   : > { %s103_s28 = ssub.s32 %s886_s20, %s1232_s24  ;;  %s108_s29 = sadd.s32 1, %s870_s16 }
  0x11   : > { %s105_s30 = sor.u32 %s104_s25, %s103_s28  ;;  %p163_p10 = pnand %p677_p7, %p162_p9 }
  0x12   : > { %p106_p11 = scmp.eq.s32.totalorder %s105_s30, 0  ;;  %v218_v0 = vld [vmem:[%s1215_s1 + $0x8] sm:$0xff] (!%p163_p10)  ;;  %v220_v1 = vld [vmem:[%s1215_s1 + $0x18] sm:$0xff] (!%p163_p10)  ;;  %v217_v2 = vld [vmem:[%s1215_s1] sm:$0xff] (!%p163_p10)  ;;  %s679_s11 = sshll.u32 (!%p163_p10), %s874_s17, 4  ;;  %v892_v7 = vmov (!%p163_p10), 0.0  }
  0x13   : > { %166 = sbr.rel (%p163_p10) target bundleno = 293 (0x125), region = 32  ;;  %v708_v3 = vpack.c.bf16 (!%p163_p10), %v220_v1, %v218_v0  ;;  %v219_v4 = vld [vmem:[%s1215_s1 + $0x10] sm:$0xff] (!%p163_p10)  ;;  %v222_v5 = vld [vmem:[%s1215_s1 + $0x28] sm:$0xff] (!%p163_p10)  ;;  %v224_v6 = vld [vmem:[%s1215_s1 + $0x38] sm:$0xff] (!%p163_p10)  ;;  %347 = vmatprep.mubr.f32.mxu0 (!%p163_p10), %v892_v7  ;;  %395 = vmatprep.mubr.f32.mxu1 (!%p163_p10), %v892_v7  ;;  %p191_p12 = scmp.lt.s32.totalorder (!%p163_p10), %s878_s18, 1  ;;  %vm276_vm0 = vcmask (!%p163_p10), 1043456  }
  0x14   : > { %s988_s4 = scalar_select %p106_p11, %s870_s16, %s108_s29  }
  0x15   : > { %p193_p13 = scmp.lt.s32.totalorder (!%p163_p10), %s679_s11, 31  ;;  %v710_v8 = vpack.c.bf16 (!%p163_p10), %v219_v4, %v217_v2  ;;  %v712_v9 = vpack.c.bf16 (!%p163_p10), %v224_v6, %v222_v5  ;;  %v221_v10 = vld [vmem:[%s1215_s1 + $0x20] sm:$0xff] (!%p163_p10)  ;;  %v223_v11 = vld [vmem:[%s1215_s1 + $0x30] sm:$0xff] (!%p163_p10)  ;;  %709 = vmatprep.subr.bf16.mxu0 (!%p163_p10), %v708_v3  ;;  %716 = vmatprep.subr.bf16.mxu1 (!%p163_p10), %v708_v3  ;;  %v226_v13 = vld [vmem:[%s1215_s1 + $0x48] sm:$0xf] (!%p163_p10)  ;;  %vm227_vm1 = vcmask (!%p163_p10), 293888  }
  0x16   : > { %v714_v12 = vpack.c.bf16 (!%p163_p10), %v223_v11, %v221_v10  ;;  %v225_v14 = vld [vmem:[%s1215_s1 + $0x40] sm:$0xf] (!%p163_p10)  ;;  %s187_s30 = sand.u32 (!%p163_p10), 1, %s866_s15  }
  0x17   : > { %711 = vmatpush1.bf16.msra.mxu0 (!%p163_p10), %v710_v8  ;;  %719 = vmatpush1.bf16.msra.mxu1 (!%p163_p10), %v710_v8  ;;  %s678_s5 = sshll.u32 (!%p163_p10), %s187_s30, 8  ;;  %s1162_s2 = scalar_lea.sflag (!%p163_p10), [#allocation4], %s187_s30 }
  0x18   : > { %713 = vmatprep.subr.bf16.mxu0 (!%p163_p10), %v712_v9  ;;  %717 = vmatprep.subr.bf16.mxu1 (!%p163_p10), %v712_v9  ;;  %s1085_s6 = scalar_lea.vmem (!%p163_p10), [#allocation3], %s678_s5 }
  0x1a   : > { %s192_s7 = scalar_select %p191_p12, %s878_s18, 1 }
  0x1b   : > { %s1234_s11 = smov (!%p193_p13, %s679_s11), 31  ;;  %715 = vmatpush1.bf16.msra.mxu0 %v714_v12  ;;  %720 = vmatpush1.bf16.msra.mxu1 %v714_v12 }
  0x1c   : > { %s680_s8 = sshll.u32 %s192_s7, 5  ;;  %682 = vmatprep.subr.msk.mxu0 %vm276_vm0, %v226_v13  ;;  %718 = vmatprep.subr.msk.mxu1 %vm276_vm0, %v226_v13  ;;  %s707_s7 = sshll.u32 %s874_s17, 5 }
  0x1d   : > { %s196_s12 = sadd.s32 %s680_s8, %s1234_s11  ;;  %s444_s11 = sld [smem:[#allocation2]] }
  0x1e   : > { %s681_s13 = sshll.u32 %s196_s12, 3  ;;  %s703_s8 = sshll.u32 %s878_s18, 6 }
  0x1f   : > { %s1025_s25 = scalar_lea.vmem %s1214_s0, %s681_s13  ;;  %683 = vmatpush1.msk.msra.mxu0 %vm276_vm0, %v225_v14  ;;  %721 = vmatpush1.msk.msra.mxu1 %vm276_vm0, %v225_v14  ;;  %s1131_s9 = sadd.s32 %s707_s7, %s703_s8 }
  0x20   : > { %v201_v15 = vld [vmem:[%s1025_s25] sm:$0xff]  ;;  %v202_v17 = vld [vmem:[%s1025_s25 + $0x8] sm:$0xff]  ;;  %v203_v19 = vld [vmem:[%s1025_s25 + $0x10] sm:$0xff]  ;;  %s704_s17 = sshll.u32 %s1131_s9, 7  ;;  %s591_s18 = sshll.u32 %s1085_s6, 4  ;;  %s1154_s18 = int_to_ptr.vmem [resolvable:$true] %s591_s18 }
  0x21   : > { %v209_v16 = vld [vmem:[%s1025_s25 + $0x40] sm:$0xff]  ;;  %684 = vmatmul.mubr.msk.f32.vlgmr.msra.gmra.mrb[0].mxu0 %vm227_vm1, %v201_v15  ;;  %v210_v18 = vld [vmem:[%s1025_s25 + $0x48] sm:$0xff]  ;;  %v211_v20 = vld [vmem:[%s1025_s25 + $0x50] sm:$0xff]  ;;  %s1152_s13 = scalar_lea.hbm %s1217_s3, %s704_s17  ;;  %s796_s22 = scalar_lea.vmem %s1154_s18, 4096 }
  0x22   : > { %692 = vmatmul.mubr.msk.f32.vlgmr.msra.gmra.mrb[0].mxu1 %vm227_vm1, %v209_v16  ;;  %353 = vmatprep.mubr.f32.mxu0 %v892_v7  ;;  %v204_v21 = vld [vmem:[%s1025_s25 + $0x18] sm:$0xff]  ;;  %v205_v23 = vld [vmem:[%s1025_s25 + $0x20] sm:$0xff]  ;;  %v206_v25 = vld [vmem:[%s1025_s25 + $0x28] sm:$0xff]  ;;  %p797_p0 = scmp.ne.s32.totalorder %s1154_s18, %s796_s22 }
  0x23   : > { %401 = vmatprep.mubr.f32.mxu1 %v892_v7  ;;  %v212_v22 = vld [vmem:[%s1025_s25 + $0x58] sm:$0xff]  ;;  %v213_v24 = vld [vmem:[%s1025_s25 + $0x60] sm:$0xff]  ;;  %v214_v26 = vld [vmem:[%s1025_s25 + $0x68] sm:$0xff]  ;;  %v1079_v31 = vstv %s444_s11 }
  0x24   : > { %v207_v27 = vld [vmem:[%s1025_s25 + $0x30] sm:$0xff]  ;;  %v208_v29 = vld [vmem:[%s1025_s25 + $0x38] sm:$0xff]  ;;  %p798_p1 = pnand %p797_p0, %p970_p3 }
  0x25   : > { %685 = vmatmul.mubr.msk.f32.gmra.mrb[2].mxu0 %vm227_vm1, %v202_v17  ;;  %v215_v28 = vld [vmem:[%s1025_s25 + $0x70] sm:$0xff]  ;;  %v216_v30 = vld [vmem:[%s1025_s25 + $0x78] sm:$0xff]  ;;  %s893_s25 = smov [#allocation3]  }
  0x26   : > { %693 = vmatmul.mubr.msk.f32.gmra.mrb[2].mxu1 %vm227_vm1, %v210_v18  ;;  %359 = vmatprep.mubr.f32.mxu0 %v892_v7  ;;  %p799_p2 = pneg %p798_p1  ;;  %s800_s28 = sshll.u32 %s893_s25, 4  ;;  %s801_s28 = int_to_ptr.vmem [resolvable:$false] %s800_s28 }
  0x27   : > { %407 = vmatprep.mubr.f32.mxu1 %v892_v7  ;;  %s802_s29 = scalar_lea.vmem %s801_s28, 8192  ;;  %p803_p4 = scmp.lt.s32.totalorder %s1154_s18, %s801_s28 }
  0x28   : > { %p804_p5 = scmp.lt.s32.totalorder %s802_s29, %s796_s22 }
  0x29   : > { %686 = vmatmul.mubr.msk.f32.gmra.mrb[4].mxu0 %vm227_vm1, %v203_v19 }
  0x2a   : > { %694 = vmatmul.mubr.msk.f32.gmra.mrb[4].mxu1 %vm227_vm1, %v211_v20  ;;  %365 = vmatprep.mubr.f32.mxu0 %v892_v7  ;;  %p805_p6 = por %p804_p5, %p803_p4 }
  0x2b   : > { %413 = vmatprep.mubr.f32.mxu1 %v892_v7 }
  0x2c   : > { %p806_p7 = pnand %p805_p6, %p799_p2 }
  0x2d   : > { %687 = vmatmul.mubr.msk.f32.gmra.mrb[6].mxu0 %vm227_vm1, %v204_v21 }
  0x2e   : > { %695 = vmatmul.mubr.msk.f32.gmra.mrb[6].mxu1 %vm227_vm1, %v212_v22  ;;  %371 = vmatprep.mubr.f32.mxu0 %v892_v7 }
  0x2f   : > { %419 = vmatprep.mubr.f32.mxu1 %v892_v7 }
  0x31   : > { %688 = vmatmul.mubr.msk.f32.gmra.mrb[8].mxu0 %vm227_vm1, %v205_v23 }
  0x32   : > { %696 = vmatmul.mubr.msk.f32.gmra.mrb[8].mxu1 %vm227_vm1, %v213_v24  ;;  %377 = vmatprep.mubr.f32.mxu0 %v892_v7 }
  0x33   : > { %425 = vmatprep.mubr.f32.mxu1 %v892_v7 }
  0x35   : > { %689 = vmatmul.mubr.msk.f32.gmra.mrb[10].mxu0 %vm227_vm1, %v206_v25 }
  0x36   : > { %697 = vmatmul.mubr.msk.f32.gmra.mrb[10].mxu1 %vm227_vm1, %v214_v26  ;;  %383 = vmatprep.mubr.f32.mxu0 %v892_v7 }
  0x37   : > { %431 = vmatprep.mubr.f32.mxu1 %v892_v7 }
  0x39   : > { %690 = vmatmul.mubr.msk.f32.gmra.mrb[12].mxu0 %vm227_vm1, %v207_v27 }
  0x3a   : > { %698 = vmatmul.mubr.msk.f32.gmra.mrb[12].mxu1 %vm227_vm1, %v215_v28  ;;  %389 = vmatprep.mubr.f32.mxu0 %v892_v7 }
  0x3b   : > { %437 = vmatprep.mubr.f32.mxu1 %v892_v7 }
  0x3d   : > { %691 = vmatmul.mubr.msk.f32.gmra.mrb[14].mxu0 %vm227_vm1, %v208_v29 }
  0x3e   : > { %699 = vmatmul.mubr.msk.f32.gmra.mrb[14].mxu1 %vm227_vm1, %v216_v30 }
  0xf4   : > { %v349_v32 = vpop.f32.mrb[0].mxu0 }
  0xf5   : > { %v397_v33 = vpop.f32.mrb[0].mxu1  ;;  %vm445_vm2 = vcmp.ge.f32.partialorder %v349_v32, 0.0  ;;  %v478_v34 = vmul.f32 %v1079_v31, %v349_v32  ;;  %v351_v36 = vpop.f32.mrb[1].mxu0 }
  0xf6   : > { %vm461_vm3 = vcmp.ge.f32.partialorder %v397_v33, 0.0  ;;  %v494_v35 = vmul.f32 %v1079_v31, %v397_v33  ;;  %v399_v37 = vpop.f32.mrb[1].mxu1  ;;  %vm446_vm4 = vcmp.ge.f32.partialorder %v351_v36, 0.0  ;;  %v479_v38 = vmul.f32 %v1079_v31, %v351_v36 }
  0xf7   : > { %vm462_vm5 = vcmp.ge.f32.partialorder %v399_v37, 0.0  ;;  %v495_v39 = vmul.f32 %v1079_v31, %v399_v37  ;;  %v510_v40 = vsel %vm445_vm2, %v349_v32, %v478_v34 }
  0xf8   : > { %v526_v41 = vsel %vm461_vm3, %v397_v33, %v494_v35  ;;  %542 = vst [vmem:[%s1085_s6] sm:$0xff] %v510_v40  ;;  %v511_v42 = vsel %vm446_vm4, %v351_v36, %v479_v38  ;;  %v355_v44 = vpop.f32.mrb[2].mxu0 }
  0xf9   : > { %558 = vst [vmem:[%s1085_s6 + $0x80] sm:$0xff] %v526_v41  ;;  %v527_v43 = vsel %vm462_vm5, %v399_v37, %v495_v39  ;;  %v403_v45 = vpop.f32.mrb[2].mxu1  ;;  %544 = vst [vmem:[%s1085_s6 + $0x10] sm:$0xff] %v511_v42  ;;  %vm447_vm6 = vcmp.ge.f32.partialorder %v355_v44, 0.0  ;;  %v480_v46 = vmul.f32 %v1079_v31, %v355_v44  ;;  %v357_v48 = vpop.f32.mrb[3].mxu0 }
  0xfa   : > { %560 = vst [vmem:[%s1085_s6 + $0x90] sm:$0xff] %v527_v43  ;;  %vm463_vm7 = vcmp.ge.f32.partialorder %v403_v45, 0.0  ;;  %v496_v47 = vmul.f32 %v1079_v31, %v403_v45  ;;  %v405_v49 = vpop.f32.mrb[3].mxu1  ;;  %vm448_vm8 = vcmp.ge.f32.partialorder %v357_v48, 0.0  ;;  %v481_v50 = vmul.f32 %v1079_v31, %v357_v48 }
  0xfb   : > { %vm464_vm9 = vcmp.ge.f32.partialorder %v405_v49, 0.0  ;;  %v497_v51 = vmul.f32 %v1079_v31, %v405_v49  ;;  %v512_v52 = vsel %vm447_vm6, %v355_v44, %v480_v46 }
  0xfc   : > { %v528_v53 = vsel %vm463_vm7, %v403_v45, %v496_v47  ;;  %543 = vst [vmem:[%s1085_s6 + $0x8] sm:$0xff] %v512_v52  ;;  %v513_v54 = vsel %vm448_vm8, %v357_v48, %v481_v50  ;;  %v361_v56 = vpop.f32.mrb[4].mxu0 }
  0xfd   : > { %559 = vst [vmem:[%s1085_s6 + $0x88] sm:$0xff] %v528_v53  ;;  %v529_v55 = vsel %vm464_vm9, %v405_v49, %v497_v51  ;;  %v409_v57 = vpop.f32.mrb[4].mxu1  ;;  %545 = vst [vmem:[%s1085_s6 + $0x18] sm:$0xff] %v513_v54  ;;  %vm449_vm10 = vcmp.ge.f32.partialorder %v361_v56, 0.0  ;;  %v482_v58 = vmul.f32 %v1079_v31, %v361_v56  ;;  %v363_v60 = vpop.f32.mrb[5].mxu0 }
  0xfe   : > { %561 = vst [vmem:[%s1085_s6 + $0x98] sm:$0xff] %v529_v55  ;;  %vm465_vm11 = vcmp.ge.f32.partialorder %v409_v57, 0.0  ;;  %v498_v59 = vmul.f32 %v1079_v31, %v409_v57  ;;  %v411_v61 = vpop.f32.mrb[5].mxu1  ;;  %vm450_vm12 = vcmp.ge.f32.partialorder %v363_v60, 0.0  ;;  %v483_v62 = vmul.f32 %v1079_v31, %v363_v60 }
  0xff   : > { %vm466_vm13 = vcmp.ge.f32.partialorder %v411_v61, 0.0  ;;  %v499_v63 = vmul.f32 %v1079_v31, %v411_v61  ;;  %v514_v0 = vsel %vm449_vm10, %v361_v56, %v482_v58 }
 0x100   : > { %v530_v1 = vsel %vm465_vm11, %v409_v57, %v498_v59  ;;  %546 = vst [vmem:[%s1085_s6 + $0x20] sm:$0xff] %v514_v0  ;;  %v515_v2 = vsel %vm450_vm12, %v363_v60, %v483_v62  ;;  %v367_v4 = vpop.f32.mrb[6].mxu0 }
 0x101   : > { %562 = vst [vmem:[%s1085_s6 + $0xa0] sm:$0xff] %v530_v1  ;;  %v531_v3 = vsel %vm466_vm13, %v411_v61, %v499_v63  ;;  %v415_v5 = vpop.f32.mrb[6].mxu1  ;;  %548 = vst [vmem:[%s1085_s6 + $0x30] sm:$0xff] %v515_v2  ;;  %vm451_vm14 = vcmp.ge.f32.partialorder %v367_v4, 0.0  ;;  %v484_v6 = vmul.f32 %v1079_v31, %v367_v4  ;;  %v369_v8 = vpop.f32.mrb[7].mxu0 }
 0x102   : > { %564 = vst [vmem:[%s1085_s6 + $0xb0] sm:$0xff] %v531_v3  ;;  %vm467_vm15 = vcmp.ge.f32.partialorder %v415_v5, 0.0  ;;  %v500_v7 = vmul.f32 %v1079_v31, %v415_v5  ;;  %v417_v9 = vpop.f32.mrb[7].mxu1  ;;  %vm452_vm0 = vcmp.ge.f32.partialorder %v369_v8, 0.0  ;;  %v485_v10 = vmul.f32 %v1079_v31, %v369_v8 }
 0x103   : > { %vm468_vm1 = vcmp.ge.f32.partialorder %v417_v9, 0.0  ;;  %v501_v11 = vmul.f32 %v1079_v31, %v417_v9  ;;  %v516_v12 = vsel %vm451_vm14, %v367_v4, %v484_v6 }
 0x104   : > { %v532_v13 = vsel %vm467_vm15, %v415_v5, %v500_v7  ;;  %547 = vst [vmem:[%s1085_s6 + $0x28] sm:$0xff] %v516_v12  ;;  %v517_v14 = vsel %vm452_vm0, %v369_v8, %v485_v10  ;;  %v373_v16 = vpop.f32.mrb[8].mxu0 }
 0x105   : > { %563 = vst [vmem:[%s1085_s6 + $0xa8] sm:$0xff] %v532_v13  ;;  %v533_v15 = vsel %vm468_vm1, %v417_v9, %v501_v11  ;;  %v421_v17 = vpop.f32.mrb[8].mxu1  ;;  %549 = vst [vmem:[%s1085_s6 + $0x38] sm:$0xff] %v517_v14  ;;  %vm453_vm2 = vcmp.ge.f32.partialorder %v373_v16, 0.0  ;;  %v486_v18 = vmul.f32 %v1079_v31, %v373_v16  ;;  %v375_v20 = vpop.f32.mrb[9].mxu0 }
 0x106   : > { %565 = vst [vmem:[%s1085_s6 + $0xb8] sm:$0xff] %v533_v15  ;;  %vm469_vm3 = vcmp.ge.f32.partialorder %v421_v17, 0.0  ;;  %v502_v19 = vmul.f32 %v1079_v31, %v421_v17  ;;  %v423_v21 = vpop.f32.mrb[9].mxu1  ;;  %vm454_vm4 = vcmp.ge.f32.partialorder %v375_v20, 0.0  ;;  %v487_v22 = vmul.f32 %v1079_v31, %v375_v20 }
 0x107   : > { %vm470_vm5 = vcmp.ge.f32.partialorder %v423_v21, 0.0  ;;  %v503_v23 = vmul.f32 %v1079_v31, %v423_v21  ;;  %v518_v24 = vsel %vm453_vm2, %v373_v16, %v486_v18 }
 0x108   : > { %v534_v25 = vsel %vm469_vm3, %v421_v17, %v502_v19  ;;  %550 = vst [vmem:[%s1085_s6 + $0x40] sm:$0xff] %v518_v24  ;;  %v519_v26 = vsel %vm454_vm4, %v375_v20, %v487_v22  ;;  %v379_v28 = vpop.f32.mrb[10].mxu0 }
 0x109   : > { %566 = vst [vmem:[%s1085_s6 + $0xc0] sm:$0xff] %v534_v25  ;;  %v535_v27 = vsel %vm470_vm5, %v423_v21, %v503_v23  ;;  %v427_v29 = vpop.f32.mrb[10].mxu1  ;;  %552 = vst [vmem:[%s1085_s6 + $0x50] sm:$0xff] %v519_v26  ;;  %vm455_vm6 = vcmp.ge.f32.partialorder %v379_v28, 0.0  ;;  %v488_v30 = vmul.f32 %v1079_v31, %v379_v28  ;;  %v381_v33 = vpop.f32.mrb[11].mxu0 }
 0x10a   : > { %568 = vst [vmem:[%s1085_s6 + $0xd0] sm:$0xff] %v535_v27  ;;  %vm471_vm7 = vcmp.ge.f32.partialorder %v427_v29, 0.0  ;;  %v504_v32 = vmul.f32 %v1079_v31, %v427_v29  ;;  %v429_v34 = vpop.f32.mrb[11].mxu1  ;;  %vm456_vm8 = vcmp.ge.f32.partialorder %v381_v33, 0.0  ;;  %v489_v35 = vmul.f32 %v1079_v31, %v381_v33 }
 0x10b   : > { %vm472_vm9 = vcmp.ge.f32.partialorder %v429_v34, 0.0  ;;  %v505_v36 = vmul.f32 %v1079_v31, %v429_v34  ;;  %v520_v37 = vsel %vm455_vm6, %v379_v28, %v488_v30 }
 0x10c   : > { %v536_v38 = vsel %vm471_vm7, %v427_v29, %v504_v32  ;;  %551 = vst [vmem:[%s1085_s6 + $0x48] sm:$0xff] %v520_v37  ;;  %v521_v39 = vsel %vm456_vm8, %v381_v33, %v489_v35  ;;  %v385_v41 = vpop.f32.mrb[12].mxu0 }
 0x10d   : > { %567 = vst [vmem:[%s1085_s6 + $0xc8] sm:$0xff] %v536_v38  ;;  %v537_v40 = vsel %vm472_vm9, %v429_v34, %v505_v36  ;;  %v433_v42 = vpop.f32.mrb[12].mxu1  ;;  %553 = vst [vmem:[%s1085_s6 + $0x58] sm:$0xff] %v521_v39  ;;  %vm457_vm10 = vcmp.ge.f32.partialorder %v385_v41, 0.0  ;;  %v490_v43 = vmul.f32 %v1079_v31, %v385_v41  ;;  %v387_v45 = vpop.f32.mrb[13].mxu0 }
 0x10e   : > { %569 = vst [vmem:[%s1085_s6 + $0xd8] sm:$0xff] %v537_v40  ;;  %vm473_vm11 = vcmp.ge.f32.partialorder %v433_v42, 0.0  ;;  %v506_v44 = vmul.f32 %v1079_v31, %v433_v42  ;;  %v435_v46 = vpop.f32.mrb[13].mxu1  ;;  %vm458_vm12 = vcmp.ge.f32.partialorder %v387_v45, 0.0  ;;  %v491_v47 = vmul.f32 %v1079_v31, %v387_v45 }
 0x10f   : > { %vm474_vm13 = vcmp.ge.f32.partialorder %v435_v46, 0.0  ;;  %v507_v48 = vmul.f32 %v1079_v31, %v435_v46  ;;  %v522_v49 = vsel %vm457_vm10, %v385_v41, %v490_v43 }
 0x110   : > { %v538_v50 = vsel %vm473_vm11, %v433_v42, %v506_v44  ;;  %554 = vst [vmem:[%s1085_s6 + $0x60] sm:$0xff] %v522_v49  ;;  %v523_v51 = vsel %vm458_vm12, %v387_v45, %v491_v47  ;;  %v391_v53 = vpop.f32.mrb[14].mxu0 }
 0x111   : > { %570 = vst [vmem:[%s1085_s6 + $0xe0] sm:$0xff] %v538_v50  ;;  %v539_v52 = vsel %vm474_vm13, %v435_v46, %v507_v48  ;;  %v439_v54 = vpop.f32.mrb[14].mxu1  ;;  %556 = vst [vmem:[%s1085_s6 + $0x70] sm:$0xff] %v523_v51  ;;  %vm459_vm14 = vcmp.ge.f32.partialorder %v391_v53, 0.0  ;;  %v492_v55 = vmul.f32 %v1079_v31, %v391_v53  ;;  %v393_v57 = vpop.f32.mrb[15].mxu0 }
 0x112   : > { %572 = vst [vmem:[%s1085_s6 + $0xf0] sm:$0xff] %v539_v52  ;;  %vm475_vm15 = vcmp.ge.f32.partialorder %v439_v54, 0.0  ;;  %v508_v56 = vmul.f32 %v1079_v31, %v439_v54  ;;  %v441_v58 = vpop.f32.mrb[15].mxu1  ;;  %vm460_vm0 = vcmp.ge.f32.partialorder %v393_v57, 0.0  ;;  %v493_v59 = vmul.f32 %v1079_v31, %v393_v57 }
 0x113   : > { %vm476_vm1 = vcmp.ge.f32.partialorder %v441_v58, 0.0  ;;  %v509_v60 = vmul.f32 %v1079_v31, %v441_v58  ;;  %v524_v61 = vsel %vm459_vm14, %v391_v53, %v492_v55 }
 0x114   : > { %v540_v62 = vsel %vm475_vm15, %v439_v54, %v508_v56  ;;  %555 = vst [vmem:[%s1085_s6 + $0x68] sm:$0xff] %v524_v61  ;;  %v525_v63 = vsel %vm460_vm0, %v393_v57, %v493_v59 }
 0x115   : > { %571 = vst [vmem:[%s1085_s6 + $0xe8] sm:$0xff] %v540_v62  ;;  %v541_v0 = vsel %vm476_vm1, %v441_v58, %v509_v60  ;;  %557 = vst [vmem:[%s1085_s6 + $0x78] sm:$0xff] %v525_v63 }
 0x116   : > { %573 = vst [vmem:[%s1085_s6 + $0xf8] sm:$0xff] %v541_v0 }
 0x117   : > { %809 = shalt.err (!%p806_p7)
}
 0x118   : > { %s810_s11 = scalar_lea.hbm %s1152_s13, 4096  ;;  %s814_s6 = scalar_lea.hbm %s1217_s3, 16384 }
 0x119   : > { %p811_p9 = scmp.ne.s32.totalorder %s1152_s13, %s810_s11  ;;  %p815_p12 = scmp.lt.u32.totalorder %s1152_s13, %s1217_s3 }
 0x11a   : > { %p816_p13 = scmp.lt.u32.totalorder %s814_s6, %s810_s11  ;;  %p818_p1 = scmp.lt.u32.totalorder %s810_s11, %s1152_s13 }
 0x11b   : > { %p812_p10 = pnand %p811_p9, %p970_p3 }
 0x11c   : > { %p817_p0 = por %p816_p13, %p815_p12 }
 0x11d   : > { %p813_p11 = pneg %p812_p10 }
 0x11e   : > { %p819_p2 = por %p818_p1, %p817_p0 }
 0x120   : > { %p820_p4 = pnand %p819_p2, %p813_p11 }
 0x122   : > { %823 = shalt.err (!%p820_p4)
}
 0x123   : > { %s894_s9 = smov 128   ;;  %s895_s17 = smov 8  }
 0x124   : > { %722 = dma.vmem_to_hbm [thread:$0]  (%p970_p3), %s1154_s18, 4096, %s1152_s13, %s1162_s2, %s894_s9, %s894_s9, %s895_s17  }
 0x125 PF: > { %p728_p5 = scmp.ge.s32.totalorder %s890_s21, 2  ;;  %s606_s10 = sand.u32 1, %s862_s14  }
 0x126   : > { %s607_s12 = scalar_lea.sflag [#allocation4], %s606_s10 }
 0x127   : > { %p725_p6 = pnand %p728_p5, %p979_p8 }
 0x129   : > { %857 = dma.done.wait (!%p725_p6), %s607_s12, 4096  }
 0x12a   : > { %859 = vsyncadd (!%p725_p6), %s607_s12, 4294963200  ;;  %s17_s21 = sadd.s32 1, %s890_s21   ;;  %s1220_s14 = smov %s866_s15 }
 0x12b   : > { %p14_p7 = scmp.ge.s32.totalorder %s17_s21, 6   ;;  %s1221_s15 = smov %s870_s16 }
 0x12c   : > { %s1222_s16 = smov %s988_s4  ;;  %s1223_s17 = smov %s882_s19 }
 0x12d   : > { %s1224_s18 = smov %s886_s20  ;;  %s1225_s19 = smov %s1228_s23 }
 0x12e   : > { %s1226_s20 = smov %s1232_s24  ;;  %16 = sbr.rel (!%p14_p7) target bundleno = 7 (0x7), region = 67 }
 0x135   :  { %612 = vsyncpa [#allocation4], 1 }
 0x136   :  { %614 = vsyncpa [#allocation4 + $0x1], 1 }

</bundles_post_ra>
